<compile_context>
chip_gen: v7x
topology: tpu7x:2x2x1
jax: 0.10.0
libtpu: 0.0.40
codegen_flags: <defaults>
</compile_context>

<pallas_src>
import jax
import jax.numpy as jnp
from jax.experimental import pallas as pl
from jax.experimental.pallas import tpu as pltpu


def deepsurv_kernel(x_ref, w1_ref, b1_ref, w2_ref, b2_ref, w3_ref, b3_ref,
                    o_ref):
    # ---- Layer 1: Linear -> ReLU (Dropout = id, BN1 folded into layer 2) ----
    # x may arrive as f32 or bf16; the cast is a no-op for bf16 inputs.
    xb = x_ref[...].astype(jnp.bfloat16)                       # (TB, F)
    h = jnp.dot(xb, w1_ref[...],
                preferred_element_type=jnp.float32) + b1_ref[...]
    h = jnp.maximum(h, 0.0)

    # ---- Layer 2: Linear -> ReLU (Dropout = id, BN2 folded into the head) ----
    h = jnp.dot(h.astype(jnp.bfloat16), w2_ref[...],
                preferred_element_type=jnp.float32) + b2_ref[...]
    h = jnp.maximum(h, 0.0)

    # ---- Output head: Linear(H, 1), emitted lane-dense ----------------------
    # (1, H) contracted with (TB, H) on the H axis -> (1, TB) row (same
    # contraction pattern as q·k^T in flash attention), so the writeback is a
    # lane-dense row instead of TB/8 masked column stores.
    row = jax.lax.dot_general(
        w3_ref[...], h,
        dimension_numbers=(((1,), (1,)), ((), ())),
        preferred_element_type=jnp.float32) + b3_ref[0]        # (1, TB)
    o_ref[0] = row.astype(o_ref.dtype)


def _pick_block_b(batch, n_features, itemsize, requested):
    """Batch-tile selection (primary tuning knob).

    * Large tiles amortize the ~0.35 us per-grid-step overhead.
    * Auto mode clamps to ceil(batch/2) so the grid keeps >= 2 steps and
      v7x's two TensorCores both get work via dimension_semantics=("parallel",).
    * Tiles are rounded up to a multiple of 128 so the transposed head row
      stores as unmasked, lane-dense vst (requested values are rounded too).
    * The x double-buffer (lane-padded F -> 128) is kept well under the
      smallest scoped-VMEM default (v7x: 32 MiB of a 64 MiB core).
    """
    if requested is None:
        tb = min(2048, -(-batch // 2))
    else:
        tb = int(requested)
    tb = max(tb, 8)
    tb = -(-tb // 128) * 128                     # lane-aligned writeback

    padded_f = -(-n_features // 128) * 128       # VMEM lane padding of x
    budget = 24 * 1024 * 1024                    # headroom under 32 MiB scoped
    if 2 * tb * padded_f * itemsize > budget:
        tb = max(128, (budget // (2 * padded_f * itemsize)) // 128 * 128)
    return tb


def deepsurv_forward(x, params, *, block_b=None):
    """x: [B, F] float32 (or bfloat16).  Returns [B, 1] float32 risk scores.

    If the upstream producer already has bf16 features, pass them directly
    (the kernel truncates to bf16 before the MXU anyway); do NOT add a
    wrapper-side astype — that is an extra un-fused HBM pass over x.
    """
    B, F = x.shape
    H = params["w1"].shape[1]
    itemsize = jnp.dtype(x.dtype).itemsize

    tb = _pick_block_b(B, F, itemsize, block_b)

    # Pad batch to a multiple of the batch tile (sliced off at the end).
    pad = (-B) % tb
    if pad:
        x = jnp.pad(x, ((0, pad), (0, 0)))
    Bp = x.shape[0]
    num_tiles = Bp // tb

    resident = lambda shape: pl.BlockSpec(shape, lambda i: (0, 0))

    flops = 2 * Bp * (F * H + H * H + H)
    bytes_accessed = (Bp * F * itemsize + Bp * 4        # x in, risk out
                      + F * H * 2 + H * H * 2           # bf16 weights
                      + 3 * H * 4 + 4)                  # biases + head row

    out = pl.pallas_call(
        deepsurv_kernel,
        out_shape=jax.ShapeDtypeStruct((num_tiles, 1, tb), jnp.float32),
        grid_spec=pl.GridSpec(
            grid=(num_tiles,),
            in_specs=[
                # x streams per grid step; weights/biases use constant index
                # maps so they stay VMEM-resident (no re-DMA across steps).
                # (If tiles ever must stay small, pipeline_mode=pl.Buffered(3)
                #  on this spec is the cheap v6e fallback.)
                pl.BlockSpec((tb, F), lambda i: (i, 0)),             # x tile
                resident((F, H)),                                    # w1 (bf16)
                resident((1, H)),                                    # b1
                resident((H, H)),                                    # w2' (bf16)
                resident((1, H)),                                    # b2'
                resident((1, H)),                                    # w3' row
                pl.BlockSpec(memory_space=pltpu.MemorySpace.SMEM),   # b3' scalar
            ],
            out_specs=pl.BlockSpec((1, 1, tb), lambda i: (i, 0, 0)),
        ),
        compiler_params=pltpu.CompilerParams(
            dimension_semantics=("parallel",)),
        cost_estimate=pl.CostEstimate(
            flops=flops, transcendentals=0, bytes_accessed=bytes_accessed),
    )(x,
      params["w1"], params["b1"],
      params["w2"], params["b2"],
      params["w3_row"], params["b3"])

    return out.reshape(Bp, 1)[:B]


def init_params(key, n_features, hidden_size=64, eps=1e-5):
    """Deterministic synthetic params mirroring DeepSurv.__init__ shapes,
    with eval-mode BatchNorm folded into the downstream Linear layers."""
    ks = jax.random.split(key, 8)

    def linear(kw, kb, fan_in, fan_out):
        # PyTorch Linear default init: U(-1/sqrt(fan_in), 1/sqrt(fan_in)).
        bound = 1.0 / jnp.sqrt(fan_in)
        w = jax.random.uniform(kw, (fan_in, fan_out), jnp.float32, -bound, bound)
        b = jax.random.uniform(kb, (1, fan_out), jnp.float32, -bound, bound)
        return w, b

    w1, b1 = linear(ks[0], ks[1], n_features, hidden_size)
    w2, b2 = linear(ks[2], ks[3], hidden_size, hidden_size)
    w3, b3 = linear(ks[4], ks[5], hidden_size, 1)

    # BatchNorm1d eval mode: y = x * scale + shift with
    #   scale = gamma / sqrt(running_var + eps), shift = beta - mean * scale.
    # TODO(synk): training-mode BatchNorm (batch statistics) is not expressible
    # in this folded eval-mode kernel.
    def bn(kmean, h):
        gamma = jnp.ones((1, h), jnp.float32)
        beta = jnp.zeros((1, h), jnp.float32)
        run_mean = 0.1 * jax.random.normal(kmean, (1, h), jnp.float32)
        run_var = jnp.ones((1, h), jnp.float32)
        scale = gamma / jnp.sqrt(run_var + eps)
        shift = beta - run_mean * scale
        return scale, shift

    s1, t1 = bn(ks[6], hidden_size)
    s2, t2 = bn(ks[7], hidden_size)

    # Exact fold of the post-ReLU affine BN into the next Linear:
    #   (h*s + t) @ W + b == h @ (diag(s) @ W) + (t @ W + b)
    w2f = s1.reshape(-1, 1) * w2            # (H, H)
    b2f = t1 @ w2 + b2                      # (1, H)
    w3f = s2.reshape(-1, 1) * w3            # (H, 1)
    b3f = (t2 @ w3 + b3).reshape(1)         # (1,)

    return dict(
        w1=w1.astype(jnp.bfloat16),
        b1=b1,
        w2=w2f.astype(jnp.bfloat16),
        b2=b2f,
        w3_row=w3f.reshape(1, hidden_size),  # f32 row for the head contraction
        b3=b3f,                              # f32 SMEM scalar
    )


def deepsurv_reference(x, p):
    """Pure-JAX reference with the same dtype policy as the kernel."""
    h = jnp.dot(x.astype(jnp.bfloat16), p["w1"],
                preferred_element_type=jnp.float32) + p["b1"]
    h = jnp.maximum(h, 0.0)
    h = jnp.dot(h.astype(jnp.bfloat16), p["w2"],
                preferred_element_type=jnp.float32) + p["b2"]
    h = jnp.maximum(h, 0.0)
    return jnp.sum(h * p["w3_row"], axis=-1, keepdims=True) + p["b3"]


if __name__ == "__main__":
    key = jax.random.PRNGKey(0)
    k_x, k_p = jax.random.split(key)

    batch = 512          # auto tile -> block_b=256, grid=(2,) (megacore-friendly)
    n_features = 16
    hidden = 64          # PyTorch module default

    x = jax.random.normal(k_x, (batch, n_features), jnp.float32)
    params = init_params(k_p, n_features, hidden)

    out = deepsurv_forward(x, params)
    out = jax.block_until_ready(out)

    ref = deepsurv_reference(x, params)
    assert out.shape == (batch, 1)
    assert jnp.allclose(out, ref, atol=2e-3, rtol=2e-3), (
        float(jnp.max(jnp.abs(out - ref))))

    print("KERNEL_OK")
</pallas_src>

<mosaic_0001>
module attributes {stable_mosaic.version = 11 : i64} {
  func.func @deepsurv_kernel(%arg0: i32, %arg1: memref<256x16xf32, #tpu.memory_space<vmem>>, %arg2: memref<16x64xbf16, #tpu.memory_space<vmem>>, %arg3: memref<1x64xf32, #tpu.memory_space<vmem>>, %arg4: memref<64x64xbf16, #tpu.memory_space<vmem>>, %arg5: memref<1x64xf32, #tpu.memory_space<vmem>>, %arg6: memref<1x64xf32, #tpu.memory_space<vmem>>, %arg7: memref<1xf32, #tpu.memory_space<smem>>, %arg8: memref<1x1x256xf32, #tpu.memory_space<vmem>>) attributes {dimension_semantics = [#tpu.dimension_semantics<parallel>], iteration_bounds = array<i64: 2>, scalar_prefetch = 0 : i64, scratch_operands = 0 : i64, tpu.core_type = #tpu.core_type<tc>, window_params = [{transform_indices = @transform_0, window_bounds = array<i64: 256, 16>}, {pipeline_mode = #tpu.pipeline_mode<synchronous>, transform_indices = @transform_1, window_bounds = array<i64: 16, 64>}, {pipeline_mode = #tpu.pipeline_mode<synchronous>, transform_indices = @transform_2, window_bounds = array<i64: 1, 64>}, {pipeline_mode = #tpu.pipeline_mode<synchronous>, transform_indices = @transform_3, window_bounds = array<i64: 64, 64>}, {pipeline_mode = #tpu.pipeline_mode<synchronous>, transform_indices = @transform_4, window_bounds = array<i64: 1, 64>}, {pipeline_mode = #tpu.pipeline_mode<synchronous>, transform_indices = @transform_5, window_bounds = array<i64: 1, 64>}, {transform_indices = @transform_6, window_bounds = array<i64: 1>}, {transform_indices = @transform_7, window_bounds = array<i64: 1, 1, 256>}]} {
    %c0 = arith.constant 0 : index
    %c0_0 = arith.constant 0 : index
    %0 = vector.load %arg1[%c0, %c0_0] : memref<256x16xf32, #tpu.memory_space<vmem>>, vector<256x16xf32>
    %1 = arith.truncf %0 : vector<256x16xf32> to vector<256x16xbf16>
    %c0_1 = arith.constant 0 : index
    %c0_2 = arith.constant 0 : index
    %2 = vector.load %arg2[%c0_1, %c0_2] : memref<16x64xbf16, #tpu.memory_space<vmem>>, vector<16x64xbf16>
    %cst = arith.constant dense<0.000000e+00> : vector<256x64xf32>
    %3 = tpu.matmul %1, %2, %cst {dimension_numbers = #tpu.dot_dimension_numbers<[1], [0], [0], [1], [0, 0, 1, 1], [], []>} : vector<256x16xbf16>, vector<16x64xbf16>, vector<256x64xf32> -> vector<256x64xf32>
    %c0_3 = arith.constant 0 : index
    %c0_4 = arith.constant 0 : index
    %4 = vector.load %arg3[%c0_3, %c0_4] : memref<1x64xf32, #tpu.memory_space<vmem>>, vector<1x64xf32>
    %5 = vector.broadcast %4 : vector<1x64xf32> to vector<256x64xf32>
    %6 = arith.addf %3, %5 : vector<256x64xf32>
    %cst_5 = arith.constant 0.000000e+00 : f32
    %7 = vector.broadcast %cst_5 : f32 to vector<256x64xf32>
    %8 = arith.maximumf %6, %7 : vector<256x64xf32>
    %9 = arith.truncf %8 : vector<256x64xf32> to vector<256x64xbf16>
    %c0_6 = arith.constant 0 : index
    %c0_7 = arith.constant 0 : index
    %10 = vector.load %arg4[%c0_6, %c0_7] : memref<64x64xbf16, #tpu.memory_space<vmem>>, vector<64x64xbf16>
    %cst_8 = arith.constant dense<0.000000e+00> : vector<256x64xf32>
    %11 = tpu.matmul %9, %10, %cst_8 {dimension_numbers = #tpu.dot_dimension_numbers<[1], [0], [0], [1], [0, 0, 1, 1], [], []>} : vector<256x64xbf16>, vector<64x64xbf16>, vector<256x64xf32> -> vector<256x64xf32>
    %c0_9 = arith.constant 0 : index
    %c0_10 = arith.constant 0 : index
    %12 = vector.load %arg5[%c0_9, %c0_10] : memref<1x64xf32, #tpu.memory_space<vmem>>, vector<1x64xf32>
    %13 = vector.broadcast %12 : vector<1x64xf32> to vector<256x64xf32>
    %14 = arith.addf %11, %13 : vector<256x64xf32>
    %cst_11 = arith.constant 0.000000e+00 : f32
    %15 = vector.broadcast %cst_11 : f32 to vector<256x64xf32>
    %16 = arith.maximumf %14, %15 : vector<256x64xf32>
    %c0_12 = arith.constant 0 : index
    %c0_13 = arith.constant 0 : index
    %17 = vector.load %arg6[%c0_12, %c0_13] : memref<1x64xf32, #tpu.memory_space<vmem>>, vector<1x64xf32>
    %cst_14 = arith.constant dense<0.000000e+00> : vector<1x256xf32>
    %18 = tpu.matmul %17, %16, %cst_14 {dimension_numbers = #tpu.dot_dimension_numbers<[1], [1], [0], [0], [0, 0, 1, 0], [], []>} : vector<1x64xf32>, vector<256x64xf32>, vector<1x256xf32> -> vector<1x256xf32>
    %c0_15 = arith.constant 0 : index
    %19 = memref.load %arg7[%c0_15] : memref<1xf32, #tpu.memory_space<smem>>
    %20 = vector.broadcast %19 : f32 to vector<1x256xf32>
    %21 = arith.addf %18, %20 : vector<1x256xf32>
    %c0_16 = arith.constant 0 : index
    %c0_17 = arith.constant 0 : index
    %c0_18 = arith.constant 0 : index
    %22 = vector.load %arg8[%c0_16, %c0_17, %c0_18] : memref<1x1x256xf32, #tpu.memory_space<vmem>>, vector<1x1x256xf32>
    %23 = vector.shape_cast %22 : vector<1x1x256xf32> to vector<1x256xf32>
    %24 = vector.shape_cast %21 : vector<1x256xf32> to vector<1x1x256xf32>
    tpu.vector_store %arg8[%c0_16, %c0_17, %c0_18], %24 {strides = array<i32>} : memref<1x1x256xf32, #tpu.memory_space<vmem>>, vector<1x1x256xf32>,
    return
  }
  func.func @transform_0(%arg0: i32) -> (i32, i32) {
    %c0_i32 = arith.constant 0 : i32
    %c0_i32_0 = arith.constant 0 : i32
    return %arg0, %c0_i32 : i32, i32
  }
  func.func @transform_1(%arg0: i32) -> (i32, i32) {
    %c0_i32 = arith.constant 0 : i32
    %c0_i32_0 = arith.constant 0 : i32
    %c0_i32_1 = arith.constant 0 : i32
    return %c0_i32, %c0_i32_0 : i32, i32
  }
  func.func @transform_2(%arg0: i32) -> (i32, i32) {
    %c0_i32 = arith.constant 0 : i32
    %c0_i32_0 = arith.constant 0 : i32
    %c0_i32_1 = arith.constant 0 : i32
    return %c0_i32, %c0_i32_0 : i32, i32
  }
  func.func @transform_3(%arg0: i32) -> (i32, i32) {
    %c0_i32 = arith.constant 0 : i32
    %c0_i32_0 = arith.constant 0 : i32
    %c0_i32_1 = arith.constant 0 : i32
    return %c0_i32, %c0_i32_0 : i32, i32
  }
  func.func @transform_4(%arg0: i32) -> (i32, i32) {
    %c0_i32 = arith.constant 0 : i32
    %c0_i32_0 = arith.constant 0 : i32
    %c0_i32_1 = arith.constant 0 : i32
    return %c0_i32, %c0_i32_0 : i32, i32
  }
  func.func @transform_5(%arg0: i32) -> (i32, i32) {
    %c0_i32 = arith.constant 0 : i32
    %c0_i32_0 = arith.constant 0 : i32
    %c0_i32_1 = arith.constant 0 : i32
    return %c0_i32, %c0_i32_0 : i32, i32
  }
  func.func @transform_6(%arg0: i32) -> i32 {
    %c0_i32 = arith.constant 0 : i32
    %c0_i32_0 = arith.constant 0 : i32
    return %c0_i32 : i32
  }
  func.func @transform_7(%arg0: i32) -> (i32, i32, i32) {
    %c0_i32 = arith.constant 0 : i32
    %c0_i32_0 = arith.constant 0 : i32
    %c0_i32_1 = arith.constant 0 : i32
    return %arg0, %c0_i32, %c0_i32_0 : i32, i32, i32
  }
}

</mosaic_0001>

<bundles_post_ra>
// kernel: tpu_custom_call.1
= control target key start
LH: loop header
LB: loop body
LE: loop exit
PB: predicated region body
PF: predicated region fallthrough
CT: control target
= control target key end

     0   :  { %s1910_s0 = inlined_call_operand.vmem [shape: f32[512,16], index: 0, kind: input, shape index: {}]   ;;  %s1911_s1 = inlined_call_operand.vmem [shape: bf16[16,64], index: 1, kind: input, shape index: {}]   ;;  %s1912_s2 = inlined_call_operand.vmem [shape: f32[1,64], index: 2, kind: input, shape index: {}]   ;;  %s1913_s3 = inlined_call_operand.vmem [shape: bf16[64,64], index: 3, kind: input, shape index: {}]   ;;  %s1914_s4 = inlined_call_operand.vmem [shape: f32[1,64], index: 4, kind: input, shape index: {}]   ;;  %s1915_s5 = inlined_call_operand.vmem [shape: f32[1,64], index: 5, kind: input, shape index: {}]   ;;  %s1916_s6 = inlined_call_operand.<no memory space> [shape: f32[1], index: 6, kind: input, shape index: {}]   ;;  %s1917_s7 = inlined_call_operand.hbm [shape: f32[2,1,256], index: 7, kind: output, shape index: {}]  }
   0x1   :  { %12 = sst [smem:[#allocation2]] %s1916_s6 }
   0x2   :  { %13 = vsyncpa [#allocation4], 0 }
   0x3   :  { %15 = vsyncpa [#allocation4 + $0x1], 0  ;;  %s1585_s26 = smov 0   ;;  %s1587_s27 = smov 0  }
   0x4   :  { %s1589_s28 = smov 0   ;;  %s1591_s29 = smov 0  }
   0x5 LB: > { %s1152_s6 = sadd.s32 4294967295, %s1538_s29   ;;  %s1153_s30 = sadd.s32 4294967294, %s1538_s29   ;;  %s1538_s29 = sphi %s1591_s29, %s1925_s29   ;;  %s1534_s28 = sphi %s1589_s28, %s1924_s28   ;;  %s1530_s27 = sphi %s1587_s27, %s1923_s27   ;;  %s1526_s26 = sphi %s1585_s26, %s1922_s26  }
   0x6   : > { %s1608_s8 = sadd.s32 1, %s1538_s29   ;;  %s180_s9 = sadd.s32 1, %s1534_s28 }
   0x7   : > { %s177_s10 = ssub.s32 %s1538_s29, %s1608_s8  ;;  %p190_p0 = scmp.ne.s32.totalorder %s1534_s28, %s1530_s27 }
   0x8   : > { %p178_p1 = scmp.eq.s32.totalorder %s177_s10, 0  ;;  %p191_p2 = scmp.eq.s32.totalorder %s1152_s6, 1 }
   0x9   : > { %p196_p3 = scmp.ne.s32.totalorder %s1530_s27, %s1526_s26  ;;  %p197_p4 = scmp.eq.s32.totalorder %s1153_s30, 1 }
   0xa   : > { %s1618_s11 = scalar_select %p178_p1, %s1534_s28, %s180_s9  }
   0xb   : > { %p1620_p5 = por %p191_p2, %p190_p0  ;;  %p1624_p6 = por %p197_p4, %p196_p3 }
   0xc   : > { %p1156_p7 = scmp.ge.s32.totalorder %s1538_s29, 1  ;;  %p242_p8 = scmp.lt.s32.totalorder %s1538_s29, 3 }
   0xe   : > { %p243_p9 = pnand %p1156_p7, %p242_p8 }
   0xf   : > { %v1471_v0 = vld [vmem:[%s1911_s1] sm:$0xff] (!%p243_p9)   ;;  %s1633_s16 = sshll.u32 (!%p243_p9), %s1152_s6, 5  ;;  %v1473_v2 = vld [vmem:[%s1913_s3 + $0x8] sm:$0xff] (!%p243_p9)   ;;  %vm344_vm0 = vcmask (!%p243_p9), 130048   ;;  %v1474_v51 = vld [vmem:[%s1913_s3 + $0x10] sm:$0xff] (!%p243_p9)   ;;  %vm641_vm1 = vcmask (!%p243_p9), 523264  }
  0x10   : > { %246 = sbr.rel (%p243_p9) target bundleno = 805 (0x325), region = 48  ;;  %p275_p10 = scmp.lt.s32.totalorder (!%p243_p9), %s1633_s16, 63  ;;  %1309 = vmatprep.subr.bf16.mxu0 (!%p243_p9), %v1471_v0  ;;  %v1472_v1 = vld [vmem:[%s1913_s3] sm:$0xff] (!%p243_p9)   ;;  %v1475_v52 = vld [vmem:[%s1913_s3 + $0x18] sm:$0xff] (!%p243_p9)   ;;  %vm1805_vm2 = vmpackc.low (!%p243_p9), %vm641_vm1, %vm641_vm1 }
  0x11   : > { %1310 = vmatpush3.bf16.msra.mxu0 (!%p243_p9), %v1471_v0  ;;  %1343 = vmatprep.subr.bf16.mxu1 (!%p243_p9), %v1472_v1  ;;  %v1705_v53 = vld [vmem:[%s1912_s2] ss:$0 sm:$0xff] (!%p243_p9)  ;;  %s884_s21 = sld [smem:[#allocation2]] (!%p243_p9)  ;;  %s1868_s9 = scalar_lea.hbm (!%p243_p9), %s1917_s7, %s1633_s16 }
  0x12   : > { %1344 = vmatpush3.bf16.msra.mxu1 (!%p243_p9), %v1472_v1  ;;  %s1541_s15 = smov (!%p243_p9), [#allocation3]  }
  0x13   : > { %1345 = vmatprep.subr.bf16.mxu1 (!%p243_p9), %v1473_v2  ;;  %s1480_s17 = sshll.u32 (!%p243_p9), %s1541_s15, 4  ;;  %s1481_s17 = int_to_ptr.vmem [resolvable:$false] %s1480_s17 }
  0x14   : > { %s1482_s18 = scalar_lea.vmem (!%p243_p9), %s1481_s17, 64 }
  0x16   : > { %1346 = vmatpush3.bf16.msra.mxu1 (!%p243_p9), %v1473_v2 }
  0x17   : > { %s276_s19 = scalar_select %p275_p10, %s1633_s16, 63  ;;  %1347 = vmatprep.subr.bf16.mxu1 %v1474_v51 }
  0x19   : > { %s1159_s22 = sshll.u32 %s276_s19, 3 }
  0x1a   : > { %s1646_s25 = scalar_lea.vmem %s1910_s0, %s1159_s22  ;;  %1348 = vmatpush3.bf16.msra.mxu1 %v1474_v51  ;;  %s271_s22 = sand.u32 1, %s1530_s27  }
  0x1b   : > { %v281_v3 = vld [vmem:[%s1646_s25] sm:$0xff]  ;;  %v282_v4 = vld [vmem:[%s1646_s25 + $0x8] sm:$0xff]  ;;  %v283_v5 = vld [vmem:[%s1646_s25 + $0x10] sm:$0xff]  ;;  %1349 = vmatprep.subr.bf16.mxu1 %v1475_v52  ;;  %s1157_s23 = sshll.u32 %s271_s22, 1  ;;  %s1080_s10 = scalar_lea.sflag [#allocation4], %s271_s22 }
  0x1c   : > { %v313_v6 = vpack.c.bf16 %v282_v4, %v281_v3  ;;  %v284_v7 = vld [vmem:[%s1646_s25 + $0x18] sm:$0xff]  ;;  %v285_v8 = vld [vmem:[%s1646_s25 + $0x20] sm:$0xff]  ;;  %v286_v9 = vld [vmem:[%s1646_s25 + $0x28] sm:$0xff]  ;;  %s273_s24 = scalar_lea.vmem [#allocation3], %s1157_s23 }
  0x1d   : > { %v314_v10 = vpack.c.bf16 %v284_v7, %v283_v5  ;;  %v315_v11 = vpack.c.bf16 %v286_v9, %v285_v8  ;;  %v287_v12 = vld [vmem:[%s1646_s25 + $0x30] sm:$0xff]  ;;  %v288_v13 = vld [vmem:[%s1646_s25 + $0x38] sm:$0xff]  ;;  %v289_v14 = vld [vmem:[%s1646_s25 + $0x40] sm:$0xff] }
  0x1e   : > { %1311 = vmatprep.mubr.msk.bf16.mxu0 %vm344_vm0, %v313_v6  ;;  %v290_v15 = vld [vmem:[%s1646_s25 + $0x48] sm:$0xff]  ;;  %v316_v16 = vpack.c.bf16 %v288_v13, %v287_v12  ;;  %v291_v18 = vld [vmem:[%s1646_s25 + $0x50] sm:$0xff]  ;;  %v292_v19 = vld [vmem:[%s1646_s25 + $0x58] sm:$0xff]  ;;  %1350 = vmatpush3.bf16.msra.mxu1 %v1475_v52 }
  0x1f   : > { %1312 = vmatmul.mubr.msk.bf16.vlgmr.msra.gmra.mrb[0].mxu0 %vm344_vm0, %v314_v10  ;;  %v317_v17 = vpack.c.bf16 %v290_v15, %v289_v14  ;;  %v293_v20 = vld [vmem:[%s1646_s25 + $0x60] sm:$0xff]  ;;  %v294_v21 = vld [vmem:[%s1646_s25 + $0x68] sm:$0xff]  ;;  %v318_v22 = vpack.c.bf16 %v292_v19, %v291_v18  ;;  %v295_v24 = vld [vmem:[%s1646_s25 + $0x70] sm:$0xff] }
  0x20   : > { %1315 = vmatprep.mubr.msk.bf16.mxu0 %vm344_vm0, %v315_v11  ;;  %v319_v23 = vpack.c.bf16 %v294_v21, %v293_v20  ;;  %v296_v25 = vld [vmem:[%s1646_s25 + $0x78] sm:$0xff]  ;;  %v297_v26 = vld [vmem:[%s1646_s25 + $0x80] sm:$0xff]  ;;  %v298_v27 = vld [vmem:[%s1646_s25 + $0x88] sm:$0xff] }
  0x21   : > { %v320_v28 = vpack.c.bf16 %v296_v25, %v295_v24  ;;  %v321_v29 = vpack.c.bf16 %v298_v27, %v297_v26  ;;  %v299_v30 = vld [vmem:[%s1646_s25 + $0x90] sm:$0xff]  ;;  %v300_v31 = vld [vmem:[%s1646_s25 + $0x98] sm:$0xff]  ;;  %v301_v32 = vld [vmem:[%s1646_s25 + $0xa0] sm:$0xff] }
  0x22   : > { %v302_v33 = vld [vmem:[%s1646_s25 + $0xa8] sm:$0xff]  ;;  %v322_v34 = vpack.c.bf16 %v300_v31, %v299_v30  ;;  %v303_v36 = vld [vmem:[%s1646_s25 + $0xb0] sm:$0xff]  ;;  %v304_v37 = vld [vmem:[%s1646_s25 + $0xb8] sm:$0xff] }
  0x23   : > { %v323_v35 = vpack.c.bf16 %v302_v33, %v301_v32  ;;  %v305_v38 = vld [vmem:[%s1646_s25 + $0xc0] sm:$0xff]  ;;  %v306_v39 = vld [vmem:[%s1646_s25 + $0xc8] sm:$0xff]  ;;  %v324_v40 = vpack.c.bf16 %v304_v37, %v303_v36  ;;  %v307_v42 = vld [vmem:[%s1646_s25 + $0xd0] sm:$0xff] }
  0x24   : > { %v325_v41 = vpack.c.bf16 %v306_v39, %v305_v38  ;;  %v308_v43 = vld [vmem:[%s1646_s25 + $0xd8] sm:$0xff]  ;;  %v309_v44 = vld [vmem:[%s1646_s25 + $0xe0] sm:$0xff]  ;;  %v310_v45 = vld [vmem:[%s1646_s25 + $0xe8] sm:$0xff] }
  0x25   : > { %v326_v46 = vpack.c.bf16 %v308_v43, %v307_v42  ;;  %v327_v47 = vpack.c.bf16 %v310_v45, %v309_v44  ;;  %v311_v48 = vld [vmem:[%s1646_s25 + $0xf0] sm:$0xff]  ;;  %v312_v49 = vld [vmem:[%s1646_s25 + $0xf8] sm:$0xff]  ;;  %s1094_s25 = sshll.u32 %s273_s24, 4  ;;  %s1870_s25 = int_to_ptr.vmem [resolvable:$true] %s1094_s25 }
  0x26   : > { %v328_v50 = vpack.c.bf16 %v312_v49, %v311_v48  ;;  %s1476_s14 = scalar_lea.vmem %s1870_s25, 32  ;;  %p1483_p0 = scmp.lt.s32.totalorder %s1870_s25, %s1481_s17 }
  0x27   : > { %1316 = vmatmul.mubr.msk.bf16.gmra.mrb[4].mxu0 %vm344_vm0, %v316_v16  ;;  %p1477_p11 = scmp.ne.s32.totalorder %s1870_s25, %s1476_s14  ;;  %p1484_p1 = scmp.lt.s32.totalorder %s1482_s18, %s1476_s14 }
  0x28   : > { %1319 = vmatprep.mubr.msk.bf16.mxu0 %vm344_vm0, %v317_v17 }
  0x29   : > { %p1478_p12 = pnand %p1477_p11, %p1620_p5  ;;  %p1485_p2 = por %p1484_p1, %p1483_p0 }
  0x2b   : > { %p1479_p13 = pneg %p1478_p12 }
  0x2d   : > { %p1486_p3 = pnand %p1485_p2, %p1479_p13 }
  0x2f   : > { %1320 = vmatmul.mubr.msk.bf16.gmra.mrb[8].mxu0 %vm344_vm0, %v318_v22 }
  0x30   : > { %1323 = vmatprep.mubr.msk.bf16.mxu0 %vm344_vm0, %v319_v23 }
  0x37   : > { %1324 = vmatmul.mubr.msk.bf16.gmra.mrb[12].mxu0 %vm344_vm0, %v320_v28 }
  0x38   : > { %1327 = vmatprep.mubr.msk.bf16.mxu0 %vm344_vm0, %v321_v29 }
  0x3f   : > { %1328 = vmatmul.mubr.msk.bf16.gmra.mrb[16].mxu0 %vm344_vm0, %v322_v34 }
  0x40   : > { %1331 = vmatprep.mubr.msk.bf16.mxu0 %vm344_vm0, %v323_v35 }
  0x47   : > { %1332 = vmatmul.mubr.msk.bf16.gmra.mrb[20].mxu0 %vm344_vm0, %v324_v40 }
  0x48   : > { %1335 = vmatprep.mubr.msk.bf16.mxu0 %vm344_vm0, %v325_v41 }
  0x4f   : > { %1336 = vmatmul.mubr.msk.bf16.gmra.mrb[24].mxu0 %vm344_vm0, %v326_v46 }
  0x50   : > { %1339 = vmatprep.mubr.msk.bf16.mxu0 %vm344_vm0, %v327_v47 }
  0x57   : > { %1340 = vmatmul.mubr.msk.bf16.gmra.mrb[28].mxu0 %vm344_vm0, %v328_v50 }
  0xf2   : > { %v1313_v54 = vpop.f32.mrb[0].mxu0 }
  0xf3   : > { %v436_v55 = vadd.f32 %v1313_v54, %v1705_v53  ;;  %v427_v56 = vpop.f32.mrb[1].mxu0 }
  0xf4   : > { %v428_v57 = vadd.f32 %v1705_v53, %v427_v56  ;;  %v1314_v58 = vpop.f32.mrb[2].mxu0 }
  0xf5   : > { %v439_v59 = vadd.f32 %v1314_v58, %v1705_v53  ;;  %v430_v60 = vpop.f32.mrb[3].mxu0  ;;  %v556_v62 = vmax.f32 %v436_v55, 0.0 }
  0xf6   : > { %v431_v61 = vadd.f32 %v1705_v53, %v430_v60  ;;  %v554_v0 = vmax.f32 %v428_v57, 0.0 }
  0xf7   : > { %v557_v63 = vmax.f32 %v439_v59, 0.0 }
  0xf8   : > { %v555_v1 = vmax.f32 %v431_v61, 0.0 }
  0xf9   : > { %v587_v2 = vpack.c.bf16 %v557_v63, %v556_v62 }
  0xfa   : > { %v1317_v3 = vpop.f32.mrb[4].mxu0  ;;  %v586_v4 = vpack.c.bf16 %v555_v1, %v554_v0 }
  0xfb   : > { %v452_v5 = vadd.f32 %v1317_v3, %v1705_v53  ;;  %v443_v6 = vpop.f32.mrb[5].mxu0 }
  0xfc   : > { %v444_v7 = vadd.f32 %v1705_v53, %v443_v6  ;;  %v1318_v8 = vpop.f32.mrb[6].mxu0  ;;  %1351 = vmatprep.mubr.msk.bf16.mxu1 %vm641_vm1, %v586_v4 }
  0xfd   : > { %v455_v9 = vadd.f32 %v1318_v8, %v1705_v53  ;;  %v446_v10 = vpop.f32.mrb[7].mxu0  ;;  %1352 = vmatmul.mubr.msk.bf16.vlgmr.msra.gmra.mrb[0].mxu1 %vm641_vm1, %v587_v2  ;;  %v560_v12 = vmax.f32 %v452_v5, 0.0 }
  0xfe   : > { %v447_v11 = vadd.f32 %v1705_v53, %v446_v10  ;;  %v558_v14 = vmax.f32 %v444_v7, 0.0 }
  0xff   : > { %v561_v13 = vmax.f32 %v455_v9, 0.0 }
 0x100   : > { %v559_v15 = vmax.f32 %v447_v11, 0.0 }
 0x101   : > { %v589_v16 = vpack.c.bf16 %v561_v13, %v560_v12 }
 0x102   : > { %v588_v17 = vpack.c.bf16 %v559_v15, %v558_v14  ;;  %v1321_v18 = vpop.f32.mrb[8].mxu0 }
 0x103   : > { %v468_v19 = vadd.f32 %v1321_v18, %v1705_v53  ;;  %v459_v20 = vpop.f32.mrb[9].mxu0 }
 0x104   : > { %v460_v21 = vadd.f32 %v1705_v53, %v459_v20  ;;  %v1322_v22 = vpop.f32.mrb[10].mxu0  ;;  %1355 = vmatprep.mubr.msk.bf16.mxu1 %vm641_vm1, %v588_v17 }
 0x105   : > { %v471_v23 = vadd.f32 %v1322_v22, %v1705_v53  ;;  %v462_v24 = vpop.f32.mrb[11].mxu0  ;;  %1356 = vmatmul.mubr.msk.bf16.gmra.mrb[4].mxu1 %vm641_vm1, %v589_v16  ;;  %v564_v26 = vmax.f32 %v468_v19, 0.0 }
 0x106   : > { %v463_v25 = vadd.f32 %v1705_v53, %v462_v24  ;;  %v562_v28 = vmax.f32 %v460_v21, 0.0 }
 0x107   : > { %v565_v27 = vmax.f32 %v471_v23, 0.0 }
 0x108   : > { %v563_v29 = vmax.f32 %v463_v25, 0.0 }
 0x109   : > { %v591_v30 = vpack.c.bf16 %v565_v27, %v564_v26 }
 0x10a   : > { %v590_v31 = vpack.c.bf16 %v563_v29, %v562_v28  ;;  %v1325_v32 = vpop.f32.mrb[12].mxu0 }
 0x10b   : > { %v484_v33 = vadd.f32 %v1325_v32, %v1705_v53  ;;  %v475_v34 = vpop.f32.mrb[13].mxu0 }
 0x10c   : > { %v476_v35 = vadd.f32 %v1705_v53, %v475_v34  ;;  %v1326_v36 = vpop.f32.mrb[14].mxu0  ;;  %1359 = vmatprep.mubr.msk.bf16.mxu1 %vm641_vm1, %v590_v31 }
 0x10d   : > { %v487_v37 = vadd.f32 %v1326_v36, %v1705_v53  ;;  %v478_v38 = vpop.f32.mrb[15].mxu0  ;;  %1360 = vmatmul.mubr.msk.bf16.gmra.mrb[8].mxu1 %vm641_vm1, %v591_v30  ;;  %v568_v40 = vmax.f32 %v484_v33, 0.0 }
 0x10e   : > { %v479_v39 = vadd.f32 %v1705_v53, %v478_v38  ;;  %v566_v42 = vmax.f32 %v476_v35, 0.0 }
 0x10f   : > { %v569_v41 = vmax.f32 %v487_v37, 0.0 }
 0x110   : > { %v567_v43 = vmax.f32 %v479_v39, 0.0  ;;  %v1758_v39 = vld [vmem:[%s1915_s5] sm:$0x1] }
 0x111   : > { %v593_v44 = vpack.c.bf16 %v569_v41, %v568_v40  ;;  %1307 = vmatprep.mubr.msk.f32.mxu0 %vm641_vm1, %v1758_v39 }
 0x112   : > { %v592_v45 = vpack.c.bf16 %v567_v43, %v566_v42  ;;  %v1329_v46 = vpop.f32.mrb[16].mxu0 }
 0x113   : > { %v500_v47 = vadd.f32 %v1329_v46, %v1705_v53  ;;  %v491_v48 = vpop.f32.mrb[17].mxu0 }
 0x114   : > { %v492_v49 = vadd.f32 %v1705_v53, %v491_v48  ;;  %v1330_v50 = vpop.f32.mrb[18].mxu0  ;;  %1363 = vmatprep.mubr.msk.bf16.mxu1 %vm641_vm1, %v592_v45 }
 0x115   : > { %v503_v51 = vadd.f32 %v1330_v50, %v1705_v53  ;;  %v494_v52 = vpop.f32.mrb[19].mxu0  ;;  %1364 = vmatmul.mubr.msk.bf16.gmra.mrb[12].mxu1 %vm641_vm1, %v593_v44  ;;  %v572_v55 = vmax.f32 %v500_v47, 0.0 }
 0x116   : > { %v495_v54 = vadd.f32 %v1705_v53, %v494_v52  ;;  %v570_v57 = vmax.f32 %v492_v49, 0.0 }
 0x117   : > { %v573_v56 = vmax.f32 %v503_v51, 0.0 }
 0x118   : > { %v571_v58 = vmax.f32 %v495_v54, 0.0 }
 0x119   : > { %v595_v59 = vpack.c.bf16 %v573_v56, %v572_v55 }
 0x11a   : > { %v594_v60 = vpack.c.bf16 %v571_v58, %v570_v57  ;;  %v1333_v61 = vpop.f32.mrb[20].mxu0 }
 0x11b   : > { %v516_v62 = vadd.f32 %v1333_v61, %v1705_v53  ;;  %v507_v63 = vpop.f32.mrb[21].mxu0 }
 0x11c   : > { %v508_v0 = vadd.f32 %v1705_v53, %v507_v63  ;;  %1367 = vmatprep.mubr.msk.bf16.mxu1 %vm641_vm1, %v594_v60  ;;  %v1334_v1 = vpop.f32.mrb[22].mxu0 }
 0x11d   : > { %v576_v2 = vmax.f32 %v516_v62, 0.0  ;;  %v519_v3 = vadd.f32 %v1334_v1, %v1705_v53  ;;  %1368 = vmatmul.mubr.msk.bf16.gmra.mrb[16].mxu1 %vm641_vm1, %v595_v59  ;;  %v510_v4 = vpop.f32.mrb[23].mxu0 }
 0x11e   : > { %v574_v5 = vmax.f32 %v508_v0, 0.0  ;;  %v511_v6 = vadd.f32 %v1705_v53, %v510_v4 }
 0x11f   : > { %v577_v7 = vmax.f32 %v519_v3, 0.0 }
 0x120   : > { %v575_v8 = vmax.f32 %v511_v6, 0.0 }
 0x121   : > { %v597_v9 = vpack.c.bf16 %v577_v7, %v576_v2 }
 0x122   : > { %v596_v10 = vpack.c.bf16 %v575_v8, %v574_v5  ;;  %v1337_v11 = vpop.f32.mrb[24].mxu0 }
 0x123   : > { %v532_v12 = vadd.f32 %v1337_v11, %v1705_v53  ;;  %v523_v13 = vpop.f32.mrb[25].mxu0 }
 0x124   : > { %1371 = vmatprep.mubr.msk.bf16.mxu1 %vm641_vm1, %v596_v10  ;;  %v524_v14 = vadd.f32 %v1705_v53, %v523_v13  ;;  %v1338_v15 = vpop.f32.mrb[26].mxu0 }
 0x125   : > { %1372 = vmatmul.mubr.msk.bf16.gmra.mrb[20].mxu1 %vm641_vm1, %v597_v9  ;;  %v580_v16 = vmax.f32 %v532_v12, 0.0  ;;  %v535_v17 = vadd.f32 %v1338_v15, %v1705_v53  ;;  %v526_v18 = vpop.f32.mrb[27].mxu0 }
 0x126   : > { %v578_v19 = vmax.f32 %v524_v14, 0.0  ;;  %v527_v20 = vadd.f32 %v1705_v53, %v526_v18 }
 0x127   : > { %v581_v21 = vmax.f32 %v535_v17, 0.0 }
 0x128   : > { %v579_v22 = vmax.f32 %v527_v20, 0.0 }
 0x129   : > { %v599_v23 = vpack.c.bf16 %v581_v21, %v580_v16 }
 0x12a   : > { %v598_v24 = vpack.c.bf16 %v579_v22, %v578_v19  ;;  %v1341_v25 = vpop.f32.mrb[28].mxu0 }
 0x12b   : > { %v548_v26 = vadd.f32 %v1341_v25, %v1705_v53  ;;  %v539_v27 = vpop.f32.mrb[29].mxu0 }
 0x12c   : > { %1375 = vmatprep.mubr.msk.bf16.mxu1 %vm641_vm1, %v598_v24  ;;  %v540_v28 = vadd.f32 %v1705_v53, %v539_v27  ;;  %v1342_v29 = vpop.f32.mrb[30].mxu0 }
 0x12d   : > { %1376 = vmatmul.mubr.msk.bf16.gmra.mrb[24].mxu1 %vm641_vm1, %v599_v23  ;;  %v584_v30 = vmax.f32 %v548_v26, 0.0  ;;  %v551_v31 = vadd.f32 %v1342_v29, %v1705_v53  ;;  %v542_v32 = vpop.f32.mrb[31].mxu0 }
 0x12e   : > { %v582_v33 = vmax.f32 %v540_v28, 0.0  ;;  %v543_v34 = vadd.f32 %v1705_v53, %v542_v32  ;;  %v1765_v53 = vld [vmem:[%s1914_s4] ss:$0 sm:$0xff] }
 0x12f   : > { %v585_v35 = vmax.f32 %v551_v31, 0.0 }
 0x130   : > { %v583_v36 = vmax.f32 %v543_v34, 0.0 }
 0x131   : > { %v601_v37 = vpack.c.bf16 %v585_v35, %v584_v30 }
 0x132   : > { %v600_v38 = vpack.c.bf16 %v583_v36, %v582_v33 }
 0x134   : > { %1379 = vmatprep.mubr.msk.bf16.mxu1 %vm641_vm1, %v600_v38 }
 0x135   : > { %1380 = vmatmul.mubr.msk.bf16.gmra.mrb[28].mxu1 %vm641_vm1, %v601_v37 }
 0x1d0   : > { %v1353_v40 = vpop.f32.mrb[0].mxu1 }
 0x1d1   : > { %v733_v41 = vadd.f32 %v1353_v40, %v1765_v53  ;;  %v724_v42 = vpop.f32.mrb[1].mxu1 }
 0x1d2   : > { %v725_v43 = vadd.f32 %v1765_v53, %v724_v42  ;;  %v1354_v44 = vpop.f32.mrb[2].mxu1 }
 0x1d3   : > { %v736_v45 = vadd.f32 %v1354_v44, %v1765_v53  ;;  %v727_v46 = vpop.f32.mrb[3].mxu1  ;;  %v853_v48 = vmax.f32 %v733_v41, 0.0 }
 0x1d4   : > { %v728_v47 = vadd.f32 %v1765_v53, %v727_v46  ;;  %v851_v50 = vmax.f32 %v725_v43, 0.0 }
 0x1d5   : > { %v854_v49 = vmax.f32 %v736_v45, 0.0 }
 0x1d6   : > { %v852_v51 = vmax.f32 %v728_v47, 0.0 }
 0x1d7   : > { %v1771_v52 = vpack.c.bf16 %v854_v49, %v853_v48 }
 0x1d8   : > { %v1773_v54 = vpack.c.bf16 %v852_v51, %v851_v50  ;;  %v1357_v55 = vpop.f32.mrb[4].mxu1 }
 0x1d9   : > { %v749_v56 = vadd.f32 %v1357_v55, %v1765_v53  ;;  %v740_v57 = vpop.f32.mrb[5].mxu1 }
 0x1da   : > { %v741_v58 = vadd.f32 %v1765_v53, %v740_v57  ;;  %v1358_v59 = vpop.f32.mrb[6].mxu1 }
 0x1db   : > { %v752_v60 = vadd.f32 %v1358_v59, %v1765_v53  ;;  %v743_v61 = vpop.f32.mrb[7].mxu1  ;;  %v857_v63 = vmax.f32 %v749_v56, 0.0 }
 0x1dc   : > { %v744_v62 = vadd.f32 %v1765_v53, %v743_v61  ;;  %v855_v1 = vmax.f32 %v741_v58, 0.0 }
 0x1dd   : > { %v858_v0 = vmax.f32 %v752_v60, 0.0 }
 0x1de   : > { %v856_v2 = vmax.f32 %v744_v62, 0.0 }
 0x1df   : > { %v1779_v3 = vpack.c.bf16 %v858_v0, %v857_v63 }
 0x1e0   : > { %v1781_v4 = vpack.c.bf16 %v856_v2, %v855_v1  ;;  %v1361_v5 = vpop.f32.mrb[8].mxu1 }
 0x1e1   : > { %v765_v6 = vadd.f32 %v1361_v5, %v1765_v53  ;;  %v756_v7 = vpop.f32.mrb[9].mxu1 }
 0x1e2   : > { %v757_v8 = vadd.f32 %v1765_v53, %v756_v7  ;;  %v1362_v9 = vpop.f32.mrb[10].mxu1 }
 0x1e3   : > { %v768_v10 = vadd.f32 %v1362_v9, %v1765_v53  ;;  %v759_v11 = vpop.f32.mrb[11].mxu1  ;;  %v861_v13 = vmax.f32 %v765_v6, 0.0 }
 0x1e4   : > { %v760_v12 = vadd.f32 %v1765_v53, %v759_v11  ;;  %v859_v15 = vmax.f32 %v757_v8, 0.0 }
 0x1e5   : > { %v862_v14 = vmax.f32 %v768_v10, 0.0 }
 0x1e6   : > { %v860_v16 = vmax.f32 %v760_v12, 0.0 }
 0x1e7   : > { %v1787_v17 = vpack.c.bf16 %v862_v14, %v861_v13 }
 0x1e8   : > { %v1789_v18 = vpack.c.bf16 %v860_v16, %v859_v15  ;;  %v1365_v19 = vpop.f32.mrb[12].mxu1 }
 0x1e9   : > { %v781_v20 = vadd.f32 %v1365_v19, %v1765_v53  ;;  %v772_v21 = vpop.f32.mrb[13].mxu1 }
 0x1ea   : > { %v773_v22 = vadd.f32 %v1765_v53, %v772_v21  ;;  %v1366_v23 = vpop.f32.mrb[14].mxu1 }
 0x1eb   : > { %v784_v24 = vadd.f32 %v1366_v23, %v1765_v53  ;;  %v775_v25 = vpop.f32.mrb[15].mxu1  ;;  %v865_v27 = vmax.f32 %v781_v20, 0.0 }
 0x1ec   : > { %v776_v26 = vadd.f32 %v1765_v53, %v775_v25  ;;  %v863_v29 = vmax.f32 %v773_v22, 0.0 }
 0x1ed   : > { %v866_v28 = vmax.f32 %v784_v24, 0.0 }
 0x1ee   : > { %v864_v30 = vmax.f32 %v776_v26, 0.0 }
 0x1ef   : > { %v1795_v31 = vpack.c.bf16 %v866_v28, %v865_v27 }
 0x1f0   : > { %v1797_v32 = vpack.c.bf16 %v864_v30, %v863_v29  ;;  %v1369_v33 = vpop.f32.mrb[16].mxu1 }
 0x1f1   : > { %v797_v34 = vadd.f32 %v1369_v33, %v1765_v53  ;;  %v788_v35 = vpop.f32.mrb[17].mxu1 }
 0x1f2   : > { %v789_v36 = vadd.f32 %v1765_v53, %v788_v35  ;;  %v1370_v37 = vpop.f32.mrb[18].mxu1 }
 0x1f3   : > { %v800_v38 = vadd.f32 %v1370_v37, %v1765_v53  ;;  %v791_v40 = vpop.f32.mrb[19].mxu1  ;;  %v869_v42 = vmax.f32 %v797_v34, 0.0 }
 0x1f4   : > { %v792_v41 = vadd.f32 %v1765_v53, %v791_v40  ;;  %v867_v44 = vmax.f32 %v789_v36, 0.0 }
 0x1f5   : > { %v870_v43 = vmax.f32 %v800_v38, 0.0 }
 0x1f6   : > { %v868_v45 = vmax.f32 %v792_v41, 0.0 }
 0x1f7   : > { %v1389_v46 = vpack.c.bf16 %v870_v43, %v869_v42 }
 0x1f8   : > { %v1383_v48 = vpack.c.bf16 %v868_v45, %v867_v44  ;;  %v1373_v49 = vpop.f32.mrb[20].mxu1 }
 0x1f9   : > { %v813_v50 = vadd.f32 %v1373_v49, %v1765_v53  ;;  %v804_v51 = vpop.f32.mrb[21].mxu1 }
 0x1fa   : > { %v805_v55 = vadd.f32 %v1765_v53, %v804_v51  ;;  %1385 = vmatprep.subr.msk.bf16.mxu0 %vm1805_vm2, %v1383_v48  ;;  %v1374_v56 = vpop.f32.mrb[22].mxu1 }
 0x1fb   : > { %v873_v57 = vmax.f32 %v813_v50, 0.0  ;;  %v816_v58 = vadd.f32 %v1374_v56, %v1765_v53  ;;  %1388 = vmatpush3.bf16.xpose.msk.msra.mxu0 %vm1805_vm2, %v1773_v54  ;;  %v807_v59 = vpop.f32.mrb[23].mxu1 }
 0x1fc   : > { %v871_v60 = vmax.f32 %v805_v55, 0.0  ;;  %v808_v61 = vadd.f32 %v1765_v53, %v807_v59  ;;  %1391 = vmatprep.subr.msk.bf16.mxu0 %vm1805_vm2, %v1389_v46 }
 0x1fd   : > { %v874_v62 = vmax.f32 %v816_v58, 0.0 }
 0x1fe   : > { %v872_v63 = vmax.f32 %v808_v61, 0.0 }
 0x1ff   : > { %v1401_v0 = vpack.c.bf16 %v874_v62, %v873_v57 }
 0x200   : > { %v1395_v1 = vpack.c.bf16 %v872_v63, %v871_v60  ;;  %v1377_v2 = vpop.f32.mrb[24].mxu1 }
 0x201   : > { %v829_v5 = vadd.f32 %v1377_v2, %v1765_v53  ;;  %v820_v6 = vpop.f32.mrb[25].mxu1 }
 0x202   : > { %v821_v7 = vadd.f32 %v1765_v53, %v820_v6  ;;  %v1378_v8 = vpop.f32.mrb[26].mxu1 }
 0x203   : > { %1394 = vmatpush3.bf16.xpose.msk.msra.mxu0 %vm1805_vm2, %v1771_v52  ;;  %v877_v54 = vmax.f32 %v829_v5, 0.0  ;;  %v832_v9 = vadd.f32 %v1378_v8, %v1765_v53  ;;  %v823_v10 = vpop.f32.mrb[27].mxu1 }
 0x204   : > { %1397 = vmatprep.subr.msk.bf16.mxu0 %vm1805_vm2, %v1395_v1  ;;  %v875_v11 = vmax.f32 %v821_v7, 0.0  ;;  %v824_v12 = vadd.f32 %v1765_v53, %v823_v10 }
 0x205   : > { %v878_v13 = vmax.f32 %v832_v9, 0.0 }
 0x206   : > { %v876_v14 = vmax.f32 %v824_v12, 0.0 }
 0x207   : > { %v1413_v15 = vpack.c.bf16 %v878_v13, %v877_v54 }
 0x208   : > { %v1407_v16 = vpack.c.bf16 %v876_v14, %v875_v11  ;;  %v1381_v19 = vpop.f32.mrb[28].mxu1 }
 0x209   : > { %v845_v20 = vadd.f32 %v1381_v19, %v1765_v53  ;;  %v836_v21 = vpop.f32.mrb[29].mxu1 }
 0x20a   : > { %v837_v52 = vadd.f32 %v1765_v53, %v836_v21  ;;  %v1382_v22 = vpop.f32.mrb[30].mxu1 }
 0x20b   : > { %1400 = vmatpush3.bf16.xpose.msk.msra.mxu0 %vm1805_vm2, %v1781_v4  ;;  %v881_v23 = vmax.f32 %v845_v20, 0.0  ;;  %v848_v24 = vadd.f32 %v1382_v22, %v1765_v53  ;;  %v839_v25 = vpop.f32.mrb[31].mxu1  ;;  %v1062_v4 = vlaneseq }
 0x20c   : > { %1403 = vmatprep.subr.msk.bf16.mxu0 %vm1805_vm2, %v1401_v0  ;;  %v879_v26 = vmax.f32 %v837_v52, 0.0  ;;  %v840_v27 = vadd.f32 %v1765_v53, %v839_v25  ;;  %v1540_v53 = vmov 1966171168  }
 0x20d   : > { %v882_v28 = vmax.f32 %v848_v24, 0.0  ;;  %v1063_v34 = vshrl.u32 %v1062_v4, 7  ;;  %vm1076_vm3 = vcmp.lt.s32.totalorder %v1062_v4, 256 }
 0x20e   : > { %v880_v29 = vmax.f32 %v840_v27, 0.0 }
 0x20f   : > { %v1425_v30 = vpack.c.bf16 %v882_v28, %v881_v23 }
 0x210   : > { %v1419_v33 = vpack.c.bf16 %v880_v29, %v879_v26 }
 0x213   : > { %1406 = vmatpush3.bf16.xpose.msk.msra.mxu0 %vm1805_vm2, %v1779_v3  ;;  %v1060_v3 = vunpack.c.l.s4 %v1540_v53 }
 0x214   : > { %1409 = vmatprep.subr.msk.bf16.mxu0 %vm1805_vm2, %v1407_v16 }
 0x21b   : > { %1412 = vmatpush3.bf16.xpose.msk.msra.mxu0 %vm1805_vm2, %v1789_v18  ;;  %v1061_v18 = vunpack.c.0.s8 %v1060_v3 }
 0x21c   : > { %1415 = vmatprep.subr.msk.bf16.mxu0 %vm1805_vm2, %v1413_v15 }
 0x21d   : > { %v1064_v38 = vsub.s32 %v1061_v18, %v1063_v34 }
 0x223   : > { %1418 = vmatpush3.bf16.xpose.msk.msra.mxu0 %vm1805_vm2, %v1787_v17  ;;  %v885_v17 = vstv %s884_s21 }
 0x224   : > { %1421 = vmatprep.subr.msk.bf16.mxu0 %vm1805_vm2, %v1419_v33 }
 0x22b   : > { %1424 = vmatpush3.bf16.xpose.msk.msra.mxu0 %vm1805_vm2, %v1797_v32 }
 0x22c   : > { %1427 = vmatprep.subr.msk.bf16.mxu0 %vm1805_vm2, %v1425_v30 }
 0x233   : > { %1430 = vmatpush3.bf16.xpose.msk.msra.mxu0 %vm1805_vm2, %v1795_v31 }
 0x23a   : > { %1308 = vmatmul.mubr.msk.f32.vlgmr.msra.gmra.mrb[32].mxu0 %vm641_vm1, %v1758_v39 }
 0x30d   : > { %v1051_v32 = vpop.f32.mrb[32].mxu0 }
 0x30e   : > { %v1052_v35 = vadd.f32 %v1051_v32, %v885_v17  ;;  %v1053_v36 = vpop.f32.mrb[33].mxu0 }
 0x30f   : > { %v1054_v37 = vadd.f32 %v1053_v36, %v885_v17 }
 0x311   : > { %v1058_v31 = vcombine.low %v1052_v35, %v1054_v37 }
 0x313   : > { %v1065_v39 = vrot.slane %v1058_v31, %v1064_v38 }
 0x315   : > { %v1072_v40 = vrot.slane %v1065_v39, %v1064_v38 }
 0x317   : > { %1078 = vst.msk [vmem:[%s273_s24] sm:$0x3] %vm1076_vm3, %v1072_v40 }
 0x318   : > { %1489 = shalt.err (!%p1486_p3)
}
 0x319   : > { %s1490_s16 = scalar_lea.hbm %s1868_s9, 32  ;;  %s1494_s21 = scalar_lea.hbm %s1917_s7, 64 }
 0x31a   : > { %p1491_p4 = scmp.ne.s32.totalorder %s1868_s9, %s1490_s16  ;;  %p1495_p9 = scmp.lt.u32.totalorder %s1868_s9, %s1917_s7 }
 0x31b   : > { %p1496_p10 = scmp.lt.u32.totalorder %s1494_s21, %s1490_s16  ;;  %p1498_p12 = scmp.lt.u32.totalorder %s1490_s16, %s1868_s9 }
 0x31c   : > { %p1492_p7 = pnand %p1491_p4, %p1620_p5 }
 0x31d   : > { %p1497_p11 = por %p1496_p10, %p1495_p9 }
 0x31e   : > { %p1493_p8 = pneg %p1492_p7 }
 0x31f   : > { %p1499_p13 = por %p1498_p12, %p1497_p11 }
 0x321   : > { %p1500_p0 = pnand %p1499_p13, %p1493_p8 }
 0x323   : > { %1503 = shalt.err (!%p1500_p0)
}
 0x324   : > { %1431 = dma.vmem_to_hbm [thread:$0]  (%p1620_p5), %s1870_s25, 32, %s1868_s9, %s1080_s10  }
 0x325 PF: > { %p1437_p1 = scmp.ge.s32.totalorder %s1538_s29, 2  ;;  %s1106_s24 = sand.u32 1, %s1526_s26  }
 0x326   : > { %s1107_s6 = scalar_lea.sflag [#allocation4], %s1106_s24 }
 0x327   : > { %p1434_p2 = pnand %p1437_p1, %p1624_p6 }
 0x329   : > { %1521 = dma.done.wait (!%p1434_p2), %s1107_s6, 32  }
 0x32a   : > { %1523 = vsyncadd (!%p1434_p2), %s1107_s6, 4294967264  ;;  %p18_p3 = scmp.ge.s32.totalorder %s1608_s8, 4   ;;  %s1922_s26 = smov %s1530_s27 }
 0x32b   : > { %s1923_s27 = smov %s1534_s28  ;;  %s1924_s28 = smov %s1618_s11 }
 0x32c   : > { %s1925_s29 = smov %s1608_s8  ;;  %20 = sbr.rel (!%p18_p3) target bundleno = 5 (0x5), region = 83 }
 0x333   :  { %1112 = vsyncpa [#allocation4], 1 }
 0x334   :  { %1114 = vsyncpa [#allocation4 + $0x1], 1 }

</bundles_post_ra>
